<compile_context>
chip_gen: v5e
topology: v5e:2x2
jax: 0.10.0
libtpu: 0.0.40
codegen_flags: <defaults>
</compile_context>

<pallas_src>
import functools

import jax
import jax.numpy as jnp
from jax.experimental import pallas as pl
from jax.experimental.pallas import tpu as pltpu

HIDDEN = 64           # logical hidden width (matches the PyTorch module)
H_PAD = 128           # hidden padded to full lane width (lane-dense matmuls)
BIAS_ROWS = 8         # one (8,128) tile holding b1/b2/b3 in rows 0/1/2
TILE_B_DEFAULT = 1024 # batch tile (multiple of 8); weights stay resident across tiles


def _round_up(n, m):
    return (n + m - 1) // m * m


def qnetwork_kernel(x_ref, p_ref, out_ref, *, s_pad, action_size, compute_dtype):
    """Fused 3-layer MLP on one (tile_b, s_pad) batch tile.

    p_ref is the packed parameter slab (128 lanes wide):
      rows [0, s_pad)               : W1 (s_pad x 128)   -- cols >= HIDDEN are zero
      rows [s_pad, s_pad+128)       : W2 (128 x 128)     -- zero outside 64x64
      rows [s_pad+128, s_pad+256)   : W3 (128 x 128)     -- zero outside 64xA
      rows [s_pad+256, s_pad+264)   : biases, row 0=b1, 1=b2, 2=b3 (zero-padded)
    Zero padding keeps padded lanes exactly 0 through relu, so lanes [0, action_size)
    of the final matmul equal the unpadded network; only those lanes are stored.
    """
    # x arrives in its native dtype; the cast to the compute dtype is free VPU filler
    # here instead of a separate wrapper-side HBM read+write pass.
    x = x_ref[...].astype(compute_dtype)

    w1 = p_ref[0:s_pad, :]
    w2 = p_ref[s_pad:s_pad + H_PAD, :]
    w3 = p_ref[s_pad + H_PAD:s_pad + 2 * H_PAD, :]
    bias = p_ref[s_pad + 2 * H_PAD:s_pad + 2 * H_PAD + BIAS_ROWS, :].astype(jnp.float32)
    b1 = bias[0:1, :]
    b2 = bias[1:2, :]
    b3 = bias[2:3, :]

    # MXU matmuls with f32 accumulation; bias-add / relu stay in f32 on the VPU
    # (v5e has no bf16 VPU), operands re-cast to the slab dtype between layers.
    h1 = jnp.maximum(jnp.dot(x, w1, preferred_element_type=jnp.float32) + b1, 0.0)
    h1 = h1.astype(compute_dtype)
    h2 = jnp.maximum(jnp.dot(h1, w2, preferred_element_type=jnp.float32) + b2, 0.0)
    h2 = h2.astype(compute_dtype)
    out = jnp.dot(h2, w3, preferred_element_type=jnp.float32) + b3

    # Narrow writeback: only the first `action_size` lanes are meaningful Q-values.
    out_ref[...] = out[:, :action_size].astype(out_ref.dtype)


def pack_params(params, compute_dtype):
    """Pack w1/b1/w2/b2/w3/b3 into one lane-dense (R, 128) slab -> a single weight DMA."""
    w1, b1, w2, b2, w3, b3 = (params[k] for k in ("w1", "b1", "w2", "b2", "w3", "b3"))
    state_size = w1.shape[0]
    action_size = w3.shape[1]
    s_pad = _round_up(state_size, 8)

    slab = jnp.zeros((s_pad + 2 * H_PAD + BIAS_ROWS, H_PAD), jnp.float32)
    slab = slab.at[:state_size, :HIDDEN].set(w1)
    r = s_pad
    slab = slab.at[r:r + HIDDEN, :HIDDEN].set(w2)
    r += H_PAD
    slab = slab.at[r:r + HIDDEN, :action_size].set(w3)
    r += H_PAD
    slab = slab.at[r + 0, :HIDDEN].set(b1.reshape(-1))
    slab = slab.at[r + 1, :HIDDEN].set(b2.reshape(-1))
    slab = slab.at[r + 2, :action_size].set(b3.reshape(-1))
    return slab.astype(compute_dtype), s_pad


def qnetwork_forward(x, params, *, compute_dtype=jnp.bfloat16, out_dtype=None,
                     tile_b=TILE_B_DEFAULT, core_parallel=False):
    """x: (B, state_size) in its native dtype. Returns (B, action_size) Q-values in out_dtype
    (defaults to compute_dtype). Set core_parallel=True on v7x for an explicit 2-TC split."""
    B, state_size = x.shape
    action_size = params["w3"].shape[1]
    out_dtype = compute_dtype if out_dtype is None else out_dtype

    slab, s_pad = pack_params(params, compute_dtype)

    # Batch tile: always a multiple of 8 (sublane constraint), no larger than needed.
    tile_b = max(8, _round_up(min(tile_b, max(B, 1)), 8))
    b_pad = _round_up(B, tile_b)

    # Only materialize a padded copy of x when the shapes are ragged; no dtype cast here
    # (the cast happens on the VPU inside the kernel), so the aligned path is zero-copy.
    if b_pad != B or s_pad != state_size:
        x_in = jnp.zeros((b_pad, s_pad), x.dtype).at[:B, :state_size].set(x)
    else:
        x_in = x

    grid = (b_pad // tile_b,)
    kernel = functools.partial(qnetwork_kernel, s_pad=s_pad,
                               action_size=action_size, compute_dtype=compute_dtype)

    # Real cost hint for XLA's scheduler (free; the kernel itself is DMA/overhead bound).
    flops = 2 * b_pad * (s_pad * H_PAD + H_PAD * H_PAD + H_PAD * H_PAD)
    bytes_accessed = (x_in.size * x_in.dtype.itemsize
                      + slab.size * slab.dtype.itemsize
                      + b_pad * action_size * jnp.dtype(out_dtype).itemsize)

    sem = (pltpu.CORE_PARALLEL if core_parallel else pltpu.PARALLEL,)

    out = pl.pallas_call(
        kernel,
        out_shape=jax.ShapeDtypeStruct((b_pad, action_size), out_dtype),
        grid=grid,
        in_specs=[
            # batch tile of activations (native dtype, cast in-kernel)
            pl.BlockSpec((tile_b, s_pad), lambda i: (i, 0)),
            # parameter slab: same block every step -> stays resident in VMEM
            pl.BlockSpec(slab.shape, lambda i: (0, 0)),
        ],
        # narrow output tile: writeback bytes = B * action_size * itemsize, not 128-lane slabs
        out_specs=pl.BlockSpec((tile_b, action_size), lambda i: (i, 0)),
        compiler_params=pltpu.CompilerParams(dimension_semantics=sem),
        cost_estimate=pl.CostEstimate(flops=flops, transcendentals=0,
                                      bytes_accessed=bytes_accessed),
    )(x_in, slab)

    # Slice only when the batch was actually padded; aligned batches return the buffer as-is.
    return out if b_pad == B else out[:B]


def init_params(key, state_size, action_size):
    """Deterministic init mimicking PyTorch Linear default: U(-1/sqrt(fan_in), 1/sqrt(fan_in))."""
    ks = jax.random.split(key, 6)

    def linear(kw, kb, fan_in, fan_out):
        bound = 1.0 / jnp.sqrt(fan_in)
        w = jax.random.uniform(kw, (fan_in, fan_out), jnp.float32, -bound, bound)
        b = jax.random.uniform(kb, (1, fan_out), jnp.float32, -bound, bound)
        return w, b

    w1, b1 = linear(ks[0], ks[1], state_size, HIDDEN)
    w2, b2 = linear(ks[2], ks[3], HIDDEN, HIDDEN)
    w3, b3 = linear(ks[4], ks[5], HIDDEN, action_size)
    return {"w1": w1, "b1": b1, "w2": w2, "b2": b2, "w3": w3, "b3": b3}


def reference_forward(x, p):
    h1 = jnp.maximum(x @ p["w1"] + p["b1"], 0.0)
    h2 = jnp.maximum(h1 @ p["w2"] + p["b2"], 0.0)
    return h2 @ p["w3"] + p["b3"]


if __name__ == "__main__":
    key = jax.random.PRNGKey(0)
    k_params, k_x, k_x2 = jax.random.split(key, 3)

    state_size = 8      # CartPole-ish flattened state
    action_size = 4
    params = init_params(k_params, state_size, action_size)

    # Case 1: ragged batch (50) with a small tile -> multi-step grid + batch-padding path.
    x = jax.random.normal(k_x, (50, state_size), jnp.float32)
    ref = reference_forward(x, params)

    # f32 path: validates exact forward semantics tightly (f32 output).
    out_f32 = jax.block_until_ready(
        qnetwork_forward(x, params, compute_dtype=jnp.float32, tile_b=16))
    assert out_f32.shape == (50, action_size)
    assert jnp.allclose(out_f32, ref, atol=1e-4, rtol=1e-4), "f32 kernel mismatch vs reference"

    # bf16 path (v6e/v7x MXU-native operands, f32 accumulation, bf16 output) -> loose tolerance.
    out_bf16 = jax.block_until_ready(
        qnetwork_forward(x, params, compute_dtype=jnp.bfloat16, tile_b=16))
    assert out_bf16.shape == (50, action_size)
    assert out_bf16.dtype == jnp.bfloat16
    assert jnp.allclose(out_bf16.astype(jnp.float32), ref, atol=5e-2, rtol=5e-2), \
        "bf16 kernel mismatch vs reference"

    # Case 2: aligned batch (64) -> zero-copy input path (no wrapper pad/slice), single-step grid.
    x2 = jax.random.normal(k_x2, (64, state_size), jnp.float32)
    ref2 = reference_forward(x2, params)
    out2 = jax.block_until_ready(
        qnetwork_forward(x2, params, compute_dtype=jnp.float32))
    assert out2.shape == (64, action_size)
    assert jnp.allclose(out2, ref2, atol=1e-4, rtol=1e-4), "aligned-path mismatch vs reference"

    print("KERNEL_OK")
</pallas_src>

<mosaic_0001>
module attributes {stable_mosaic.version = 11 : i64} {
  func.func @qnetwork_kernel(%arg0: i32, %arg1: memref<16x8xf32, #tpu.memory_space<vmem>>, %arg2: memref<272x128xf32, #tpu.memory_space<vmem>>, %arg3: memref<16x4xf32, #tpu.memory_space<vmem>>) attributes {dimension_semantics = [#tpu.dimension_semantics<parallel>], iteration_bounds = array<i64: 4>, scalar_prefetch = 0 : i64, scratch_operands = 0 : i64, tpu.core_type = #tpu.core_type<tc>, window_params = [{transform_indices = @transform_0, window_bounds = array<i64: 16, 8>}, {pipeline_mode = #tpu.pipeline_mode<synchronous>, transform_indices = @transform_1, window_bounds = array<i64: 272, 128>}, {transform_indices = @transform_2, window_bounds = array<i64: 16, 4>}]} {
    %c0 = arith.constant 0 : index
    %c0_0 = arith.constant 0 : index
    %0 = vector.load %arg1[%c0, %c0_0] : memref<16x8xf32, #tpu.memory_space<vmem>>, vector<16x8xf32>
    %c0_1 = arith.constant 0 : index
    %c0_2 = arith.constant 0 : index
    %1 = vector.load %arg2[%c0_1, %c0_2] : memref<272x128xf32, #tpu.memory_space<vmem>>, vector<8x128xf32>
    %c8 = arith.constant 8 : index
    %c0_3 = arith.constant 0 : index
    %2 = vector.load %arg2[%c8, %c0_3] : memref<272x128xf32, #tpu.memory_space<vmem>>, vector<128x128xf32>
    %c136 = arith.constant 136 : index
    %c0_4 = arith.constant 0 : index
    %3 = vector.load %arg2[%c136, %c0_4] : memref<272x128xf32, #tpu.memory_space<vmem>>, vector<128x128xf32>
    %c264 = arith.constant 264 : index
    %c0_5 = arith.constant 0 : index
    %4 = vector.load %arg2[%c264, %c0_5] : memref<272x128xf32, #tpu.memory_space<vmem>>, vector<8x128xf32>
    %5 = vector.extract_strided_slice %4 {offsets = [0, 0], sizes = [1, 128], strides = [1, 1]} : vector<8x128xf32> to vector<1x128xf32>
    %6 = vector.extract_strided_slice %4 {offsets = [1, 0], sizes = [1, 128], strides = [1, 1]} : vector<8x128xf32> to vector<1x128xf32>
    %7 = vector.extract_strided_slice %4 {offsets = [2, 0], sizes = [1, 128], strides = [1, 1]} : vector<8x128xf32> to vector<1x128xf32>
    %cst = arith.constant dense<0.000000e+00> : vector<16x128xf32>
    %8 = tpu.matmul %0, %1, %cst {dimension_numbers = #tpu.dot_dimension_numbers<[1], [0], [0], [1], [0, 0, 1, 1], [], []>} : vector<16x8xf32>, vector<8x128xf32>, vector<16x128xf32> -> vector<16x128xf32>
    %9 = vector.broadcast %5 : vector<1x128xf32> to vector<16x128xf32>
    %10 = arith.addf %8, %9 : vector<16x128xf32>
    %cst_6 = arith.constant 0.000000e+00 : f32
    %11 = vector.broadcast %cst_6 : f32 to vector<16x128xf32>
    %12 = arith.maximumf %10, %11 : vector<16x128xf32>
    %cst_7 = arith.constant dense<0.000000e+00> : vector<16x128xf32>
    %13 = tpu.matmul %12, %2, %cst_7 {dimension_numbers = #tpu.dot_dimension_numbers<[1], [0], [0], [1], [0, 0, 1, 1], [], []>} : vector<16x128xf32>, vector<128x128xf32>, vector<16x128xf32> -> vector<16x128xf32>
    %14 = vector.broadcast %6 : vector<1x128xf32> to vector<16x128xf32>
    %15 = arith.addf %13, %14 : vector<16x128xf32>
    %cst_8 = arith.constant 0.000000e+00 : f32
    %16 = vector.broadcast %cst_8 : f32 to vector<16x128xf32>
    %17 = arith.maximumf %15, %16 : vector<16x128xf32>
    %cst_9 = arith.constant dense<0.000000e+00> : vector<16x128xf32>
    %18 = tpu.matmul %17, %3, %cst_9 {dimension_numbers = #tpu.dot_dimension_numbers<[1], [0], [0], [1], [0, 0, 1, 1], [], []>} : vector<16x128xf32>, vector<128x128xf32>, vector<16x128xf32> -> vector<16x128xf32>
    %19 = vector.broadcast %7 : vector<1x128xf32> to vector<16x128xf32>
    %20 = arith.addf %18, %19 : vector<16x128xf32>
    %21 = vector.extract_strided_slice %20 {offsets = [0, 0], sizes = [16, 4], strides = [1, 1]} : vector<16x128xf32> to vector<16x4xf32>
    %c0_10 = arith.constant 0 : index
    %c0_11 = arith.constant 0 : index
    %22 = vector.load %arg3[%c0_10, %c0_11] : memref<16x4xf32, #tpu.memory_space<vmem>>, vector<16x4xf32>
    tpu.vector_store %arg3[%c0_10, %c0_11], %21 {strides = array<i32>} : memref<16x4xf32, #tpu.memory_space<vmem>>, vector<16x4xf32>,
    return
  }
  func.func @transform_0(%arg0: i32) -> (i32, i32) {
    %c0_i32 = arith.constant 0 : i32
    %c0_i32_0 = arith.constant 0 : i32
    return %arg0, %c0_i32 : i32, i32
  }
  func.func @transform_1(%arg0: i32) -> (i32, i32) {
    %c0_i32 = arith.constant 0 : i32
    %c0_i32_0 = arith.constant 0 : i32
    %c0_i32_1 = arith.constant 0 : i32
    return %c0_i32, %c0_i32_0 : i32, i32
  }
  func.func @transform_2(%arg0: i32) -> (i32, i32) {
    %c0_i32 = arith.constant 0 : i32
    %c0_i32_0 = arith.constant 0 : i32
    return %arg0, %c0_i32 : i32, i32
  }
}

</mosaic_0001>

<bundles_post_ra>
// kernel: tpu_custom_call.1
= control target key start
LH: loop header
LB: loop body
LE: loop exit
PB: predicated region body
PF: predicated region fallthrough
CT: control target
= control target key end

     0   :  { %7 = vsyncpa [#allocation3], 0  ;;  %s482_s9 = smov 0   ;;  %s511_s0 = inlined_call_operand.vmem [shape: f32[64,8], index: 0, kind: input, shape index: {}]   ;;  %s512_s1 = inlined_call_operand.hbm [shape: f32[272,128], index: 1, kind: input, shape index: {}]   ;;  %s513_s2 = inlined_call_operand.vmem [shape: f32[64,4], index: 2, kind: output, shape index: {}]  }
   0x1 LB: > { %s102_s12 = sshll.u32 %s512_s1, 4  ;;  %s354_s13 = sadd.s32 4294967295, %s462_s9   ;;  %s462_s9 = sphi %s482_s9, %s13_s9   ;;  %s103_s12 = int_to_ptr.hbm [resolvable:$true] %s102_s12 }
   0x2   : > { %p356_p0 = scmp.ge.s32.totalorder %s462_s9, 1  ;;  %p91_p1 = scmp.lt.s32.totalorder %s462_s9, 5 }
   0x3   : > { %p409_p2 = scmp.eq.s32.totalorder %s354_s13, 0  ;;  %s464_s14 = smov [#allocation2]  }
   0x4   : > { %p92_p3 = pnand %p356_p0, %p91_p1  ;;  %s104_s15 = sshll.u32 %s464_s14, 4  ;;  %s105_s15 = int_to_ptr.vmem [resolvable:$true] %s104_s15 }
   0x5   : > { %s465_s16 = smov 128   ;;  %s466_s17 = smov 8  }
   0x6   : > { %p405_p4 = pneg %p92_p3  ;;  %129 = sbr.rel (%p92_p3) target bundleno = 428 (0x1ac), region = 28 }
   0x8   : > { %p406_p5 = pnand %p409_p2, %p405_p4 }
   0xa   : > { %408 = dma.hbm_to_vmem [thread:$0]  (!%p406_p5), %s103_s12, 4352, %s105_s15, [#allocation3], %s465_s16, %s465_s16, %s466_s17  }
   0xb   : > { %457 = dma.done.wait (%p409_p2), [#allocation3], 4352  }
   0xc   : > { %459 = vsyncadd (%p409_p2), [#allocation3], 4294962944  ;;  %s361_s18 = sshll.u32 %s354_s13, 1  ;;  %vm201_vm0 = vcmask 64512   ;;  %v166_v0 = vld [vmem:[#allocation2] sm:$0xff]  ;;  %v181_v3 = vld [vmem:[#allocation2 + $0x78] sm:$0xff] }
   0xd   : > { %p153_p6 = scmp.lt.s32.totalorder %s361_s18, 7  ;;  %223 = vmatpush.msra.mxu0 %v166_v0  ;;  %v182_v2 = vld [vmem:[#allocation2 + $0x80] sm:$0xff]  ;;  %v180_v4 = vld [vmem:[#allocation2 + $0x70] sm:$0xff]  ;;  %v179_v5 = vld [vmem:[#allocation2 + $0x68] sm:$0xff]  ;;  %vm283_vm1 = vcmask 31744  }
   0xe   : > { %234 = vmatpush.msra.mxu1 %v182_v2  ;;  %369 = vmatpush.msra.mxu3 %v182_v2  ;;  %v178_v7 = vld [vmem:[#allocation2 + $0x60] sm:$0xff]  ;;  %v177_v8 = vld [vmem:[#allocation2 + $0x58] sm:$0xff]  ;;  %v176_v9 = vld [vmem:[#allocation2 + $0x50] sm:$0xff] }
   0xf   : > { %s515_s18 = smov (!%p153_p6, %s361_s18), 7  ;;  %v175_v10 = vld [vmem:[#allocation2 + $0x48] sm:$0xff]  ;;  %v174_v11 = vld [vmem:[#allocation2 + $0x40] sm:$0xff]  ;;  %v173_v12 = vld [vmem:[#allocation2 + $0x38] sm:$0xff] }
  0x10   : > { %s362_s19 = sshll.u32 %s515_s18, 3  ;;  %235 = vmatpush.msra.mxu1 %v181_v3  ;;  %370 = vmatpush.msra.mxu3 %v181_v3  ;;  %v172_v13 = vld [vmem:[#allocation2 + $0x30] sm:$0xff]  ;;  %v171_v14 = vld [vmem:[#allocation2 + $0x28] sm:$0xff]  ;;  %v170_v15 = vld [vmem:[#allocation2 + $0x20] sm:$0xff] }
  0x11   : > { %s156_s22 = scalar_lea.vmem %s511_s0, %s362_s19  ;;  %v169_v16 = vld [vmem:[#allocation2 + $0x18] sm:$0xff]  ;;  %v168_v17 = vld [vmem:[#allocation2 + $0x10] sm:$0xff]  ;;  %v167_v18 = vld [vmem:[#allocation2 + $0x8] sm:$0xff]  ;;  %s162_s25 = scalar_lea.vmem %s513_s2, %s362_s19 }
  0x12   : > { %v164_v1 = vld [vmem:[%s156_s22] sm:$0xff]  ;;  %236 = vmatpush.msra.mxu1 %v180_v4  ;;  %v165_v6 = vld [vmem:[%s156_s22 + $0x8] sm:$0xff]  ;;  %371 = vmatpush.msra.mxu3 %v180_v4  ;;  %v197_v20 = vld [vmem:[#allocation2 + $0xf8] sm:$0xff] }
  0x13   : > { %365 = vmatmul.msk.f32.vlgmr.msra.gmra.mxu0 %vm201_vm0, %v164_v1  ;;  %v198_v19 = vld [vmem:[#allocation2 + $0x100] sm:$0xff]  ;;  %v196_v21 = vld [vmem:[#allocation2 + $0xf0] sm:$0xff]  ;;  %v195_v22 = vld [vmem:[#allocation2 + $0xe8] sm:$0xff] }
  0x14   : > { %237 = vmatpush.msra.mxu1 %v179_v5  ;;  %372 = vmatpush.msra.mxu3 %v179_v5  ;;  %v194_v23 = vld [vmem:[#allocation2 + $0xe0] sm:$0xff]  ;;  %v193_v24 = vld [vmem:[#allocation2 + $0xd8] sm:$0xff]  ;;  %v192_v25 = vld [vmem:[#allocation2 + $0xd0] sm:$0xff] }
  0x15   : > { %260 = vmatpush.msrb.mxu0 %v198_v19  ;;  %385 = vmatpush.msra.mxu2 %v198_v19  ;;  %v191_v26 = vld [vmem:[#allocation2 + $0xc8] sm:$0xff]  ;;  %v190_v28 = vld [vmem:[#allocation2 + $0xc0] sm:$0xff]  ;;  %v189_v30 = vld [vmem:[#allocation2 + $0xb8] sm:$0xff] }
  0x16   : > { %238 = vmatpush.msra.mxu1 %v178_v7  ;;  %373 = vmatpush.msra.mxu3 %v178_v7  ;;  %v199_v27 = vld [vmem:[#allocation2 + $0x108] sm:$0xff]  ;;  %v188_v31 = vld [vmem:[#allocation2 + $0xb0] sm:$0xff]  ;;  %v186_v36 = vld [vmem:[#allocation2 + $0xa0] sm:$0xff] }
  0x17   : > { %261 = vmatpush.msrb.mxu0 %v197_v20  ;;  %386 = vmatpush.msra.mxu2 %v197_v20  ;;  %v200_v29 = vperm.slane %v199_v27, 0  ;;  %v187_v34 = vld [vmem:[#allocation2 + $0xa8] sm:$0xff]  ;;  %v185_v40 = vld [vmem:[#allocation2 + $0x98] sm:$0xff]  ;;  %v184_v41 = vld [vmem:[#allocation2 + $0x90] sm:$0xff]  ;;  %v233_v43 = vperm.slane %v199_v27, 1  ;;  %v259_v50 = vperm.slane %v199_v27, 2 }
  0x18   : > { %239 = vmatpush.msra.mxu1 %v177_v8  ;;  %374 = vmatpush.msra.mxu3 %v177_v8  ;;  %v183_v42 = vld [vmem:[#allocation2 + $0x88] sm:$0xff] }
  0x19   : > { %262 = vmatpush.msrb.mxu0 %v196_v21  ;;  %387 = vmatpush.msra.mxu2 %v196_v21 }
  0x1a   : > { %240 = vmatpush.msra.mxu1 %v176_v9  ;;  %375 = vmatpush.msra.mxu3 %v176_v9 }
  0x1b   : > { %366 = vmatmul.msk.f32.gmra.mxu0 %vm201_vm0, %v165_v6  ;;  %388 = vmatpush.msra.mxu2 %v195_v22 }
  0x1c   : > { %241 = vmatpush.msra.mxu1 %v175_v10  ;;  %376 = vmatpush.msra.mxu3 %v175_v10 }
  0x1d   : > { %263 = vmatpush.msrb.mxu0 %v195_v22  ;;  %389 = vmatpush.msra.mxu2 %v194_v23 }
  0x1e   : > { %242 = vmatpush.msra.mxu1 %v174_v11  ;;  %377 = vmatpush.msra.mxu3 %v174_v11 }
  0x1f   : > { %264 = vmatpush.msrb.mxu0 %v194_v23  ;;  %390 = vmatpush.msra.mxu2 %v193_v24 }
  0x20   : > { %243 = vmatpush.msra.mxu1 %v173_v12  ;;  %378 = vmatpush.msra.mxu3 %v173_v12 }
  0x21   : > { %265 = vmatpush.msrb.mxu0 %v193_v24  ;;  %391 = vmatpush.msra.mxu2 %v192_v25 }
  0x22   : > { %244 = vmatpush.msra.mxu1 %v172_v13  ;;  %379 = vmatpush.msra.mxu3 %v172_v13 }
  0x23   : > { %266 = vmatpush.msrb.mxu0 %v192_v25  ;;  %392 = vmatpush.msra.mxu2 %v191_v26 }
  0x24   : > { %245 = vmatpush.msra.mxu1 %v171_v14  ;;  %380 = vmatpush.msra.mxu3 %v171_v14 }
  0x25   : > { %267 = vmatpush.msrb.mxu0 %v191_v26  ;;  %393 = vmatpush.msra.mxu2 %v190_v28 }
  0x26   : > { %246 = vmatpush.msra.mxu1 %v170_v15  ;;  %381 = vmatpush.msra.mxu3 %v170_v15 }
  0x27   : > { %268 = vmatpush.msrb.mxu0 %v190_v28  ;;  %394 = vmatpush.msra.mxu2 %v189_v30 }
  0x28   : > { %247 = vmatpush.msra.mxu1 %v169_v16  ;;  %382 = vmatpush.msra.mxu3 %v169_v16 }
  0x29   : > { %269 = vmatpush.msrb.mxu0 %v189_v30  ;;  %395 = vmatpush.msra.mxu2 %v188_v31 }
  0x2a   : > { %248 = vmatpush.msra.mxu1 %v168_v17  ;;  %383 = vmatpush.msra.mxu3 %v168_v17 }
  0x2b   : > { %270 = vmatpush.msrb.mxu0 %v188_v31  ;;  %396 = vmatpush.msra.mxu2 %v187_v34 }
  0x2c   : > { %249 = vmatpush.msra.mxu1 %v167_v18  ;;  %384 = vmatpush.msra.mxu3 %v167_v18 }
  0x2d   : > { %271 = vmatpush.msrb.mxu0 %v187_v34  ;;  %397 = vmatpush.msra.mxu2 %v186_v36 }
  0x2f   : > { %272 = vmatpush.msrb.mxu0 %v186_v36  ;;  %398 = vmatpush.msra.mxu2 %v185_v40 }
  0x31   : > { %273 = vmatpush.msrb.mxu0 %v185_v40  ;;  %399 = vmatpush.msra.mxu2 %v184_v41 }
  0x33   : > { %274 = vmatpush.msrb.mxu0 %v184_v41  ;;  %400 = vmatpush.msra.mxu2 %v183_v42 }
  0x35   : > { %275 = vmatpush.msrb.mxu0 %v183_v42 }
  0x90   : > { %v225_v32 = vpop.f32.mrf.mxu0 }
  0x91   : > { %v226_v33 = vadd.f32 %v225_v32, %v200_v29 }
  0x93   : > { %v231_v35 = vmax.f32 %v226_v33, 0.0 }
  0x95   : > { %250 = vmatmul.f32.vlgmr.msra.gmra.mxu1 %v231_v35 }
  0x98   : > { %v228_v37 = vpop.f32.mrf.mxu0 }
  0x99   : > { %v229_v38 = vadd.f32 %v228_v37, %v200_v29 }
  0x9b   : > { %v232_v39 = vmax.f32 %v229_v38, 0.0 }
  0x9d   : > { %253 = vmatmul.f32.vlgmr.msra.gmra.mxu3 %v232_v39 }
 0x112   : > { %v251_v44 = vpop.f32.mrf.mxu1 }
 0x113   : > { %v252_v45 = vadd.f32 %v251_v44, %v233_v43 }
 0x115   : > { %v257_v46 = vmax.f32 %v252_v45, 0.0 }
 0x117   : > { %276 = vmatmul.f32.vlgmr.msrb.gmra.mxu0 %v257_v46 }
 0x120   : > { %v254_v47 = vpop.f32.mrf.mxu3 }
 0x121   : > { %v255_v48 = vadd.f32 %v254_v47, %v233_v43 }
 0x123   : > { %v258_v49 = vmax.f32 %v255_v48, 0.0 }
 0x125   : > { %279 = vmatmul.f32.vlgmr.msra.gmra.mxu2 %v258_v49 }
 0x194   : > { %v277_v51 = vpop.f32.mrf.mxu0 }
 0x195   : > { %v278_v52 = vadd.f32 %v277_v51, %v259_v50 }
 0x197   : > { %284 = vst.msk [vmem:[%s162_s25] sm:$0xff] %vm283_vm1, %v278_v52 }
 0x1a8   : > { %v280_v53 = vpop.f32.mrf.mxu2 }
 0x1a9   : > { %v281_v54 = vadd.f32 %v280_v53, %v259_v50 }
 0x1ab   : > { %285 = vst.msk [vmem:[%s162_s25 + $0x8] sm:$0xff] %vm283_vm1, %v281_v54 }
 0x1ac PF: > { %s13_s9 = sadd.s32 1, %s462_s9  }
 0x1ad   : > { %p10_p7 = scmp.ge.s32.totalorder %s13_s9, 6  }
 0x1af   :  { %12 = sbr.rel (!%p10_p7) target bundleno = 1 (0x1), region = 63 }
 0x1b4   :  { %308 = vsyncpa [#allocation3], 1 }
 0x1b5   :  { %310 = vsyncpa [#allocation3 + $0x1], 1 }

</bundles_post_ra>
